<compile_context>
chip_gen: v7x
topology: tpu7x:2x2x1
jax: 0.10.0
libtpu: 0.0.40
codegen_flags: <defaults>
</compile_context>

<pallas_src>
import jax
import jax.numpy as jnp
from jax.experimental import pallas as pl
from jax.experimental.pallas import tpu as pltpu

# ----- synthetic (scaled-down) dimensions consistent with the module structure -----
Z_DIM = 16                       # z_dim
CLASS_EMB_DIM = 100              # class_embedding_dim (1000 in the original; scaled down and
                                 # deliberately NOT a multiple of 128 to exercise the padding path)
HIDDEN = 2 * CLASS_EMB_DIM       # ClassUp hidden_dim = 2 * class_embedding_dim
NEG_SLOPE = 0.01                 # nn.LeakyReLU default negative_slope

LANE = 128


def _round_up(n, m):
    return ((n + m - 1) // m) * m


Z_PAD = _round_up(Z_DIM, LANE)          # 16  -> 128
HID_PAD = _round_up(HIDDEN, LANE)       # 200 -> 256   (2000 -> 2048 at real size)
EMB_PAD = _round_up(CLASS_EMB_DIM, LANE)  # 100 -> 128 (1000 -> 1024 at real size)


def _leaky_relu(v):
    # one vmul + one vmax on the VALU (cheaper than compare + select)
    return jnp.maximum(v, NEG_SLOPE * v)


def _quantize_per_col(w):
    """Symmetric per-output-channel int8 quantization. w: (din, dout) f32."""
    amax = jnp.max(jnp.abs(w), axis=0, keepdims=True)            # (1, dout)
    scale = jnp.maximum(amax, 1e-8) / 127.0
    wq = jnp.clip(jnp.round(w / scale), -127.0, 127.0).astype(jnp.int8)
    return wq, scale


def classup_kernel(x_ref,
                   w0_ref, s0_ref, b0_ref,
                   w1_ref, s1_ref, b1_ref,
                   w2_ref, s2_ref, b2_ref,
                   w3_ref, s3_ref, b3_ref,
                   out_ref):
    """ClassUp forward: 4 Linears (bf16 MXU, f32 acc, per-channel scale), LeakyReLU, softmax."""

    def linear(act_bf16, w_ref, s_ref, b_ref):
        # Weights may be bf16 or int8; int8 values (|v| <= 127) are exact in bf16, so the
        # on-the-fly dequant keeps the MXU in bf16 on all chip generations.  Per-output-channel
        # scale + bias are applied on the f32-accumulated result (mathematically identical to
        # scaling the weights).  Keep the epilogue in f32 (portable to v5e's f32-only VPU).
        w = w_ref[...].astype(jnp.bfloat16)
        acc = jnp.dot(act_bf16, w, preferred_element_type=jnp.float32)
        return acc * s_ref[...] + b_ref[...]

    h = _leaky_relu(linear(x_ref[...], w0_ref, s0_ref, b0_ref))            # (TB, HID_PAD) f32
    h = _leaky_relu(linear(h.astype(jnp.bfloat16), w1_ref, s1_ref, b1_ref))
    h = _leaky_relu(linear(h.astype(jnp.bfloat16), w2_ref, s2_ref, b2_ref))
    logits = linear(h.astype(jnp.bfloat16), w3_ref, s3_ref, b3_ref)        # (TB, EMB_PAD) f32

    if EMB_PAD != CLASS_EMB_DIM:
        # Padded logit lanes carry exact zeros (zero-padded weights/bias); mask them out of
        # the softmax so they do not corrupt the denominator.
        col = jax.lax.broadcasted_iota(jnp.int32, logits.shape, 1)
        logits = jnp.where(col < CLASS_EMB_DIM, logits, -jnp.inf)

    # softmax along dim=1; reciprocal on the EUP slot + one Newton step for accuracy.
    m = jnp.max(logits, axis=-1, keepdims=True)
    e = jnp.exp(logits - m)
    s = jnp.sum(e, axis=-1, keepdims=True)
    inv = pl.reciprocal(s, approx=True)
    inv = inv * (2.0 - s * inv)            # Newton refinement: rows sum to 1 within ~1e-6
    out_ref[...] = (e * inv).astype(out_ref.dtype)


def classup_pallas(x_nchw, params, *, batch_tile=None, quantize_int8=False):
    """x_nchw: (B, C, 1, 1) with C >= Z_DIM. params: dict of [din, dout] weights / (1, dout) biases.

    batch_tile=None -> whole-batch tile (single grid step; weights DMA'd exactly once).
    For large B: cap batch_tile at 128-256 on v5e (fills its 4x128^2 MXU, keeps f32 h small),
    256+ on v6e/v7x.  quantize_int8=True halves weight DMA bytes (the binding resource on
    v5e/v6e); the MXU still runs bf16 (in-kernel dequant), so it is also valid on v7x.
    """
    B, C = x_nchw.shape[0], x_nchw.shape[1]
    assert C >= Z_DIM and x_nchw.shape[2] == 1 and x_nchw.shape[3] == 1
    if batch_tile is None:
        batch_tile = B
    assert B % batch_tile == 0

    # --- z-slice + 1x1-spatial squeeze + zero-pad the z lanes up to a full 128-lane width ---
    xz = x_nchw[:, :Z_DIM, 0, 0].astype(jnp.float32)
    x_pad = jnp.pad(xz, ((0, 0), (0, Z_PAD - Z_DIM))).astype(jnp.bfloat16)   # (B, Z_PAD) bf16

    # --- weight / scale / bias prep (zero-pad to lane-dense shapes; padding is exact) ---
    in_dims, in_pads = (Z_DIM, HIDDEN, HIDDEN, HIDDEN), (Z_PAD, HID_PAD, HID_PAD, HID_PAD)
    out_dims, out_pads = (HIDDEN, HIDDEN, HIDDEN, CLASS_EMB_DIM), (HID_PAD, HID_PAD, HID_PAD, EMB_PAD)

    ws, ss, bs = [], [], []
    for i in range(4):
        w = params[f"w{i}"].astype(jnp.float32)        # (din, dout)
        b = params[f"b{i}"].astype(jnp.float32)        # (1, dout)
        if quantize_int8:
            wq, scale = _quantize_per_col(w)           # int8 weights + f32 per-column scale
        else:
            wq, scale = w.astype(jnp.bfloat16), jnp.ones((1, w.shape[1]), jnp.float32)
        ws.append(jnp.pad(wq, ((0, in_pads[i] - in_dims[i]), (0, out_pads[i] - out_dims[i]))))
        ss.append(jnp.pad(scale, ((0, 0), (0, out_pads[i] - out_dims[i])), constant_values=1.0))
        bs.append(jnp.pad(b, ((0, 0), (0, out_pads[i] - out_dims[i]))))

    flat_consts = []
    for w, s, b in zip(ws, ss, bs):
        flat_consts += [w, s, b]

    # Grid-invariant operands: constant index_map -> fetched once across batch grid steps, and
    # single-buffered (nothing to prefetch) so the resident weight set is not doubled -- critical
    # on v7x (64 MiB physical / 32 MiB default-scoped VMEM) at the real hidden=2000/emb=1000 sizes.
    def const_spec(shape):
        return pl.BlockSpec(shape, lambda i: (0, 0), pipeline_mode=pl.Buffered(1))

    in_specs = [pl.BlockSpec((batch_tile, Z_PAD), lambda i: (i, 0))]
    for w, s, b in zip(ws, ss, bs):
        in_specs += [const_spec(w.shape), const_spec(s.shape), const_spec(b.shape)]

    # Advisory cost estimate: this call is bandwidth-heavy, let XLA overlap neighbours around it.
    const_bytes = sum(int(a.size) * a.dtype.itemsize for a in flat_consts)
    io_bytes = int(x_pad.size) * 2 + B * EMB_PAD * 4
    flops = 2 * B * (Z_PAD * HID_PAD + 2 * HID_PAD * HID_PAD + HID_PAD * EMB_PAD)
    cost = pl.CostEstimate(flops=int(flops),
                           transcendentals=int(B * EMB_PAD),
                           bytes_accessed=int(const_bytes + io_bytes))

    # VMEM budget: single-buffered constants + double-buffered activation/output tiles + slack.
    act_bytes = 2 * (batch_tile * Z_PAD * 2 + batch_tile * EMB_PAD * 4)
    vmem_limit = max(int(1.25 * (const_bytes + act_bytes)) + (4 << 20), 32 << 20)

    out_pad = pl.pallas_call(
        classup_kernel,
        out_shape=jax.ShapeDtypeStruct((B, EMB_PAD), jnp.float32),
        grid=(B // batch_tile,),
        in_specs=in_specs,
        out_specs=pl.BlockSpec((batch_tile, EMB_PAD), lambda i: (i, 0)),
        compiler_params=pltpu.CompilerParams(
            # "arbitrary": megacore-sharding the batch axis on v7x would duplicate the full
            # weight DMA into both cores' VMEM; a net loss while weight-DMA-bound.
            dimension_semantics=("arbitrary",),
            vmem_limit_bytes=vmem_limit,
        ),
        cost_estimate=cost,
    )(x_pad, *flat_consts)

    return out_pad[:, :CLASS_EMB_DIM]


def init_classup_params(key):
    """Deterministic synthetic init of the ClassUp MLP parameters.

    Weights are stored as [in_features, out_features] (already transposed vs torch)."""
    dims = [(Z_DIM, HIDDEN), (HIDDEN, HIDDEN), (HIDDEN, HIDDEN), (HIDDEN, CLASS_EMB_DIM)]
    params = {}
    keys = jax.random.split(key, 2 * len(dims))
    for idx, (din, dout) in enumerate(dims):
        scale = 1.0 / jnp.sqrt(jnp.float32(din))
        params[f"w{idx}"] = (jax.random.uniform(keys[2 * idx], (din, dout),
                                                jnp.float32, -1.0, 1.0) * scale)
        params[f"b{idx}"] = (jax.random.uniform(keys[2 * idx + 1], (1, dout),
                                                jnp.float32, -1.0, 1.0) * scale)
    return params


def biggan_decoder_wrapper_forward(x_nchw, params, *, quantize_int8=False):
    """Forward of BigGANDecoderWrapper.

    x_nchw: (B, C, 1, 1) with C >= Z_DIM (PyTorch NCHW latent).
    Returns the class embedding probabilities (B, CLASS_EMB_DIM).
    """
    emb = classup_pallas(x_nchw, params, quantize_int8=quantize_int8)
    # TODO(synk): feed `x_nchw` and `emb` to the BigGAN generator: self.decoder(x, emb).
    return emb


def _reference_forward(x_nchw, params):
    """Pure-JAX f32 reference for validation."""
    h = x_nchw[:, :Z_DIM, 0, 0].astype(jnp.float32)
    for i in range(3):
        h = h @ params[f"w{i}"] + params[f"b{i}"]
        h = jnp.where(h > 0, h, NEG_SLOPE * h)
    logits = h @ params["w3"] + params["b3"]
    return jax.nn.softmax(logits, axis=1)


if __name__ == "__main__":
    key = jax.random.PRNGKey(0)
    k_x, k_p = jax.random.split(key)

    B = 16
    # latent in PyTorch NCHW layout: [B, z_dim, 1, 1]
    x = jax.random.normal(k_x, (B, Z_DIM, 1, 1), dtype=jnp.float32)
    params = init_classup_params(k_p)

    # --- default bf16-weight path ---
    out = biggan_decoder_wrapper_forward(x, params)
    out = jax.block_until_ready(out)
    ref = _reference_forward(x, params)
    assert out.shape == (B, CLASS_EMB_DIM)
    max_err = float(jnp.max(jnp.abs(out - ref)))
    assert max_err < 3e-3, f"bf16 path mismatch vs reference (max abs err {max_err})"
    assert jnp.allclose(jnp.sum(out, axis=1), 1.0, atol=1e-3), "softmax rows must sum to ~1"

    # --- int8-weight path (halves the binding weight DMA on v5e/v6e) ---
    out_q = biggan_decoder_wrapper_forward(x, params, quantize_int8=True)
    out_q = jax.block_until_ready(out_q)
    deq = {}
    for i in range(4):
        wq, sc = _quantize_per_col(params[f"w{i}"].astype(jnp.float32))
        deq[f"w{i}"] = wq.astype(jnp.float32) * sc
        deq[f"b{i}"] = params[f"b{i}"]
    ref_q = _reference_forward(x, deq)
    max_err_q = float(jnp.max(jnp.abs(out_q - ref_q)))
    assert max_err_q < 3e-3, f"int8 path mismatch vs dequantized reference (max abs err {max_err_q})"
    assert jnp.allclose(jnp.sum(out_q, axis=1), 1.0, atol=1e-3), "softmax rows must sum to ~1"

    print("KERNEL_OK")
</pallas_src>

<mosaic_0001>
module attributes {stable_mosaic.version = 11 : i64} {
  func.func @classup_kernel(%arg0: i32, %arg1: memref<16x128xbf16, #tpu.memory_space<vmem>>, %arg2: memref<128x256xbf16, #tpu.memory_space<vmem>>, %arg3: memref<1x256xf32, #tpu.memory_space<vmem>>, %arg4: memref<1x256xf32, #tpu.memory_space<vmem>>, %arg5: memref<256x256xbf16, #tpu.memory_space<vmem>>, %arg6: memref<1x256xf32, #tpu.memory_space<vmem>>, %arg7: memref<1x256xf32, #tpu.memory_space<vmem>>, %arg8: memref<256x256xbf16, #tpu.memory_space<vmem>>, %arg9: memref<1x256xf32, #tpu.memory_space<vmem>>, %arg10: memref<1x256xf32, #tpu.memory_space<vmem>>, %arg11: memref<256x128xbf16, #tpu.memory_space<vmem>>, %arg12: memref<1x128xf32, #tpu.memory_space<vmem>>, %arg13: memref<1x128xf32, #tpu.memory_space<vmem>>, %arg14: memref<16x128xf32, #tpu.memory_space<vmem>>) attributes {dimension_semantics = [#tpu.dimension_semantics<arbitrary>], iteration_bounds = array<i64: 1>, scalar_prefetch = 0 : i64, scratch_operands = 0 : i64, tpu.core_type = #tpu.core_type<tc>, window_params = [{transform_indices = @transform_0, window_bounds = array<i64: 16, 128>}, {pipeline_mode = #tpu.pipeline_mode<synchronous>, transform_indices = @transform_1, window_bounds = array<i64: 128, 256>}, {pipeline_mode = #tpu.pipeline_mode<synchronous>, transform_indices = @transform_2, window_bounds = array<i64: 1, 256>}, {pipeline_mode = #tpu.pipeline_mode<synchronous>, transform_indices = @transform_3, window_bounds = array<i64: 1, 256>}, {pipeline_mode = #tpu.pipeline_mode<synchronous>, transform_indices = @transform_4, window_bounds = array<i64: 256, 256>}, {pipeline_mode = #tpu.pipeline_mode<synchronous>, transform_indices = @transform_5, window_bounds = array<i64: 1, 256>}, {pipeline_mode = #tpu.pipeline_mode<synchronous>, transform_indices = @transform_6, window_bounds = array<i64: 1, 256>}, {pipeline_mode = #tpu.pipeline_mode<synchronous>, transform_indices = @transform_7, window_bounds = array<i64: 256, 256>}, {pipeline_mode = #tpu.pipeline_mode<synchronous>, transform_indices = @transform_8, window_bounds = array<i64: 1, 256>}, {pipeline_mode = #tpu.pipeline_mode<synchronous>, transform_indices = @transform_9, window_bounds = array<i64: 1, 256>}, {pipeline_mode = #tpu.pipeline_mode<synchronous>, transform_indices = @transform_10, window_bounds = array<i64: 256, 128>}, {pipeline_mode = #tpu.pipeline_mode<synchronous>, transform_indices = @transform_11, window_bounds = array<i64: 1, 128>}, {pipeline_mode = #tpu.pipeline_mode<synchronous>, transform_indices = @transform_12, window_bounds = array<i64: 1, 128>}, {transform_indices = @transform_13, window_bounds = array<i64: 16, 128>}]} {
    %c0 = arith.constant 0 : index
    %c0_0 = arith.constant 0 : index
    %0 = vector.load %arg1[%c0, %c0_0] : memref<16x128xbf16, #tpu.memory_space<vmem>>, vector<16x128xbf16>
    %c0_1 = arith.constant 0 : index
    %c0_2 = arith.constant 0 : index
    %1 = vector.load %arg2[%c0_1, %c0_2] : memref<128x256xbf16, #tpu.memory_space<vmem>>, vector<128x256xbf16>
    %cst = arith.constant dense<0.000000e+00> : vector<16x256xf32>
    %2 = tpu.matmul %0, %1, %cst {dimension_numbers = #tpu.dot_dimension_numbers<[1], [0], [0], [1], [0, 0, 1, 1], [], []>} : vector<16x128xbf16>, vector<128x256xbf16>, vector<16x256xf32> -> vector<16x256xf32>
    %c0_3 = arith.constant 0 : index
    %c0_4 = arith.constant 0 : index
    %3 = vector.load %arg3[%c0_3, %c0_4] : memref<1x256xf32, #tpu.memory_space<vmem>>, vector<1x256xf32>
    %4 = vector.broadcast %3 : vector<1x256xf32> to vector<16x256xf32>
    %5 = arith.mulf %2, %4 : vector<16x256xf32>
    %c0_5 = arith.constant 0 : index
    %c0_6 = arith.constant 0 : index
    %6 = vector.load %arg4[%c0_5, %c0_6] : memref<1x256xf32, #tpu.memory_space<vmem>>, vector<1x256xf32>
    %7 = vector.broadcast %6 : vector<1x256xf32> to vector<16x256xf32>
    %8 = arith.addf %5, %7 : vector<16x256xf32>
    %cst_7 = arith.constant 0.00999999977 : f32
    %9 = vector.broadcast %cst_7 : f32 to vector<16x256xf32>
    %10 = arith.mulf %9, %8 : vector<16x256xf32>
    %11 = arith.maximumf %8, %10 : vector<16x256xf32>
    %12 = arith.truncf %11 : vector<16x256xf32> to vector<16x256xbf16>
    %c0_8 = arith.constant 0 : index
    %c0_9 = arith.constant 0 : index
    %13 = vector.load %arg5[%c0_8, %c0_9] : memref<256x256xbf16, #tpu.memory_space<vmem>>, vector<256x256xbf16>
    %cst_10 = arith.constant dense<0.000000e+00> : vector<16x256xf32>
    %14 = tpu.matmul %12, %13, %cst_10 {dimension_numbers = #tpu.dot_dimension_numbers<[1], [0], [0], [1], [0, 0, 1, 1], [], []>} : vector<16x256xbf16>, vector<256x256xbf16>, vector<16x256xf32> -> vector<16x256xf32>
    %c0_11 = arith.constant 0 : index
    %c0_12 = arith.constant 0 : index
    %15 = vector.load %arg6[%c0_11, %c0_12] : memref<1x256xf32, #tpu.memory_space<vmem>>, vector<1x256xf32>
    %16 = vector.broadcast %15 : vector<1x256xf32> to vector<16x256xf32>
    %17 = arith.mulf %14, %16 : vector<16x256xf32>
    %c0_13 = arith.constant 0 : index
    %c0_14 = arith.constant 0 : index
    %18 = vector.load %arg7[%c0_13, %c0_14] : memref<1x256xf32, #tpu.memory_space<vmem>>, vector<1x256xf32>
    %19 = vector.broadcast %18 : vector<1x256xf32> to vector<16x256xf32>
    %20 = arith.addf %17, %19 : vector<16x256xf32>
    %cst_15 = arith.constant 0.00999999977 : f32
    %21 = vector.broadcast %cst_15 : f32 to vector<16x256xf32>
    %22 = arith.mulf %21, %20 : vector<16x256xf32>
    %23 = arith.maximumf %20, %22 : vector<16x256xf32>
    %24 = arith.truncf %23 : vector<16x256xf32> to vector<16x256xbf16>
    %c0_16 = arith.constant 0 : index
    %c0_17 = arith.constant 0 : index
    %25 = vector.load %arg8[%c0_16, %c0_17] : memref<256x256xbf16, #tpu.memory_space<vmem>>, vector<256x256xbf16>
    %cst_18 = arith.constant dense<0.000000e+00> : vector<16x256xf32>
    %26 = tpu.matmul %24, %25, %cst_18 {dimension_numbers = #tpu.dot_dimension_numbers<[1], [0], [0], [1], [0, 0, 1, 1], [], []>} : vector<16x256xbf16>, vector<256x256xbf16>, vector<16x256xf32> -> vector<16x256xf32>
    %c0_19 = arith.constant 0 : index
    %c0_20 = arith.constant 0 : index
    %27 = vector.load %arg9[%c0_19, %c0_20] : memref<1x256xf32, #tpu.memory_space<vmem>>, vector<1x256xf32>
    %28 = vector.broadcast %27 : vector<1x256xf32> to vector<16x256xf32>
    %29 = arith.mulf %26, %28 : vector<16x256xf32>
    %c0_21 = arith.constant 0 : index
    %c0_22 = arith.constant 0 : index
    %30 = vector.load %arg10[%c0_21, %c0_22] : memref<1x256xf32, #tpu.memory_space<vmem>>, vector<1x256xf32>
    %31 = vector.broadcast %30 : vector<1x256xf32> to vector<16x256xf32>
    %32 = arith.addf %29, %31 : vector<16x256xf32>
    %cst_23 = arith.constant 0.00999999977 : f32
    %33 = vector.broadcast %cst_23 : f32 to vector<16x256xf32>
    %34 = arith.mulf %33, %32 : vector<16x256xf32>
    %35 = arith.maximumf %32, %34 : vector<16x256xf32>
    %36 = arith.truncf %35 : vector<16x256xf32> to vector<16x256xbf16>
    %c0_24 = arith.constant 0 : index
    %c0_25 = arith.constant 0 : index
    %37 = vector.load %arg11[%c0_24, %c0_25] : memref<256x128xbf16, #tpu.memory_space<vmem>>, vector<256x128xbf16>
    %cst_26 = arith.constant dense<0.000000e+00> : vector<16x128xf32>
    %38 = tpu.matmul %36, %37, %cst_26 {dimension_numbers = #tpu.dot_dimension_numbers<[1], [0], [0], [1], [0, 0, 1, 1], [], []>} : vector<16x256xbf16>, vector<256x128xbf16>, vector<16x128xf32> -> vector<16x128xf32>
    %c0_27 = arith.constant 0 : index
    %c0_28 = arith.constant 0 : index
    %39 = vector.load %arg12[%c0_27, %c0_28] : memref<1x128xf32, #tpu.memory_space<vmem>>, vector<1x128xf32>
    %40 = vector.broadcast %39 : vector<1x128xf32> to vector<16x128xf32>
    %41 = arith.mulf %38, %40 : vector<16x128xf32>
    %c0_29 = arith.constant 0 : index
    %c0_30 = arith.constant 0 : index
    %42 = vector.load %arg13[%c0_29, %c0_30] : memref<1x128xf32, #tpu.memory_space<vmem>>, vector<1x128xf32>
    %43 = vector.broadcast %42 : vector<1x128xf32> to vector<16x128xf32>
    %44 = arith.addf %41, %43 : vector<16x128xf32>
    %45 = tpu.iota {dimensions = array<i32: 1>} : vector<16x128xi32>
    %c100_i32 = arith.constant 100 : i32
    %46 = vector.broadcast %c100_i32 : i32 to vector<16x128xi32>
    %47 = arith.cmpi slt, %45, %46 : vector<16x128xi32>
    %cst_31 = arith.constant 0xFF800000 : f32
    %48 = vector.broadcast %cst_31 : f32 to vector<16x128xf32>
    %49 = arith.select %47, %44, %48 : vector<16x128xi1>, vector<16x128xf32>
    %cst_32 = arith.constant dense<0xFF800000> : vector<16xf32>
    %50 = vector.multi_reduction <maximumf>, %49, %cst_32 [1] : vector<16x128xf32> to vector<16xf32>
    %51 = vector.shape_cast %50 : vector<16xf32> to vector<16x1xf32>
    %52 = vector.broadcast %51 : vector<16x1xf32> to vector<16x128xf32>
    %53 = arith.subf %49, %52 : vector<16x128xf32>
    %54 = math.exp %53 : vector<16x128xf32>
    %cst_33 = arith.constant dense<0.000000e+00> : vector<16xf32>
    %55 = vector.multi_reduction <add>, %54, %cst_33 [1] : vector<16x128xf32> to vector<16xf32>
    %56 = vector.shape_cast %55 : vector<16xf32> to vector<16x1xf32>
    %57 = tpu.reciprocal %56 {approx = true} : vector<16x1xf32> -> vector<16x1xf32>
    %58 = arith.mulf %56, %57 : vector<16x1xf32>
    %cst_34 = arith.constant 2.000000e+00 : f32
    %59 = vector.broadcast %cst_34 : f32 to vector<16x1xf32>
    %60 = arith.subf %59, %58 : vector<16x1xf32>
    %61 = arith.mulf %57, %60 : vector<16x1xf32>
    %62 = vector.broadcast %61 : vector<16x1xf32> to vector<16x128xf32>
    %63 = arith.mulf %54, %62 : vector<16x128xf32>
    %c0_35 = arith.constant 0 : index
    %c0_36 = arith.constant 0 : index
    %64 = vector.load %arg14[%c0_35, %c0_36] : memref<16x128xf32, #tpu.memory_space<vmem>>, vector<16x128xf32>
    tpu.vector_store %arg14[%c0_35, %c0_36], %63 {strides = array<i32>} : memref<16x128xf32, #tpu.memory_space<vmem>>, vector<16x128xf32>,
    return
  }
  func.func @transform_0(%arg0: i32) -> (i32, i32) {
    %c0_i32 = arith.constant 0 : i32
    %c0_i32_0 = arith.constant 0 : i32
    return %arg0, %c0_i32 : i32, i32
  }
  func.func @transform_1(%arg0: i32) -> (i32, i32) {
    %c0_i32 = arith.constant 0 : i32
    %c0_i32_0 = arith.constant 0 : i32
    %c0_i32_1 = arith.constant 0 : i32
    return %c0_i32, %c0_i32_0 : i32, i32
  }
  func.func @transform_2(%arg0: i32) -> (i32, i32) {
    %c0_i32 = arith.constant 0 : i32
    %c0_i32_0 = arith.constant 0 : i32
    %c0_i32_1 = arith.constant 0 : i32
    return %c0_i32, %c0_i32_0 : i32, i32
  }
  func.func @transform_3(%arg0: i32) -> (i32, i32) {
    %c0_i32 = arith.constant 0 : i32
    %c0_i32_0 = arith.constant 0 : i32
    %c0_i32_1 = arith.constant 0 : i32
    return %c0_i32, %c0_i32_0 : i32, i32
  }
  func.func @transform_4(%arg0: i32) -> (i32, i32) {
    %c0_i32 = arith.constant 0 : i32
    %c0_i32_0 = arith.constant 0 : i32
    %c0_i32_1 = arith.constant 0 : i32
    return %c0_i32, %c0_i32_0 : i32, i32
  }
  func.func @transform_5(%arg0: i32) -> (i32, i32) {
    %c0_i32 = arith.constant 0 : i32
    %c0_i32_0 = arith.constant 0 : i32
    %c0_i32_1 = arith.constant 0 : i32
    return %c0_i32, %c0_i32_0 : i32, i32
  }
  func.func @transform_6(%arg0: i32) -> (i32, i32) {
    %c0_i32 = arith.constant 0 : i32
    %c0_i32_0 = arith.constant 0 : i32
    %c0_i32_1 = arith.constant 0 : i32
    return %c0_i32, %c0_i32_0 : i32, i32
  }
  func.func @transform_7(%arg0: i32) -> (i32, i32) {
    %c0_i32 = arith.constant 0 : i32
    %c0_i32_0 = arith.constant 0 : i32
    %c0_i32_1 = arith.constant 0 : i32
    return %c0_i32, %c0_i32_0 : i32, i32
  }
  func.func @transform_8(%arg0: i32) -> (i32, i32) {
    %c0_i32 = arith.constant 0 : i32
    %c0_i32_0 = arith.constant 0 : i32
    %c0_i32_1 = arith.constant 0 : i32
    return %c0_i32, %c0_i32_0 : i32, i32
  }
  func.func @transform_9(%arg0: i32) -> (i32, i32) {
    %c0_i32 = arith.constant 0 : i32
    %c0_i32_0 = arith.constant 0 : i32
    %c0_i32_1 = arith.constant 0 : i32
    return %c0_i32, %c0_i32_0 : i32, i32
  }
  func.func @transform_10(%arg0: i32) -> (i32, i32) {
    %c0_i32 = arith.constant 0 : i32
    %c0_i32_0 = arith.constant 0 : i32
    %c0_i32_1 = arith.constant 0 : i32
    return %c0_i32, %c0_i32_0 : i32, i32
  }
  func.func @transform_11(%arg0: i32) -> (i32, i32) {
    %c0_i32 = arith.constant 0 : i32
    %c0_i32_0 = arith.constant 0 : i32
    %c0_i32_1 = arith.constant 0 : i32
    return %c0_i32, %c0_i32_0 : i32, i32
  }
  func.func @transform_12(%arg0: i32) -> (i32, i32) {
    %c0_i32 = arith.constant 0 : i32
    %c0_i32_0 = arith.constant 0 : i32
    %c0_i32_1 = arith.constant 0 : i32
    return %c0_i32, %c0_i32_0 : i32, i32
  }
  func.func @transform_13(%arg0: i32) -> (i32, i32) {
    %c0_i32 = arith.constant 0 : i32
    %c0_i32_0 = arith.constant 0 : i32
    return %arg0, %c0_i32 : i32, i32
  }
}

</mosaic_0001>

<bundles_post_ra>
// kernel: tpu_custom_call.1
= control target key start
LH: loop header
LB: loop body
LE: loop exit
PB: predicated region body
PF: predicated region fallthrough
CT: control target
= control target key end

     0   :  { %18 = vsyncpa [#allocation3], 0  ;;  %s1724_s0 = inlined_call_operand.hbm [shape: bf16[16,128], index: 0, kind: input, shape index: {}]   ;;  %s1725_s1 = inlined_call_operand.hbm [shape: bf16[128,256], index: 1, kind: input, shape index: {}]   ;;  %s1726_s2 = inlined_call_operand.vmem [shape: f32[1,256], index: 2, kind: input, shape index: {}]   ;;  %s1727_s3 = inlined_call_operand.vmem [shape: f32[1,256], index: 3, kind: input, shape index: {}]   ;;  %s1728_s4 = inlined_call_operand.hbm [shape: bf16[256,256], index: 4, kind: input, shape index: {}]   ;;  %s1729_s5 = inlined_call_operand.vmem [shape: f32[1,256], index: 5, kind: input, shape index: {}]   ;;  %s1730_s6 = inlined_call_operand.vmem [shape: f32[1,256], index: 6, kind: input, shape index: {}]   ;;  %s1731_s7 = inlined_call_operand.hbm [shape: bf16[256,256], index: 7, kind: input, shape index: {}]   ;;  %s1732_s8 = inlined_call_operand.vmem [shape: f32[1,256], index: 8, kind: input, shape index: {}]   ;;  %s1733_s9 = inlined_call_operand.vmem [shape: f32[1,256], index: 9, kind: input, shape index: {}]   ;;  %s1734_s10 = inlined_call_operand.hbm [shape: bf16[256,128], index: 10, kind: input, shape index: {}]   ;;  %s1735_s11 = inlined_call_operand.vmem [shape: f32[1,128], index: 11, kind: input, shape index: {}]   ;;  %s1736_s12 = inlined_call_operand.vmem [shape: f32[1,128], index: 12, kind: input, shape index: {}]   ;;  %s1737_s13 = inlined_call_operand.hbm [shape: f32[16,128], index: 13, kind: output, shape index: {}]  }
   0x1   :  { %19 = vsyncpa [#allocation6], 0 }
   0x2   :  { %20 = vsyncpa [#allocation9], 0 }
   0x3   :  { %21 = vsyncpa [#allocation4], 0  ;;  %s1511_s25 = smov [#allocation5]   ;;  %s1371_s29 = scalar_lea.hbm %s1725_s1, 2048 }
   0x4   :  { %s39_s26 = sshll.u32 %s1511_s25, 4  ;;  %p1372_p0 = scmp.ne.s32.totalorder %s1725_s1, %s1371_s29  ;;  %s40_s26 = int_to_ptr.vmem [resolvable:$true] %s39_s26 }
   0x5   :  { %p1375_p1 = scmp.lt.u32.totalorder %s1371_s29, %s1725_s1 }
   0x7   :  { %p1377_p2 = pnand %p1375_p1, %p1372_p0 }
   0x9   :  { %1380 = shalt.err (!%p1377_p2)
}
   0xa   :  { %s1381_s17 = scalar_lea.vmem %s40_s26, 2048  ;;  %p1386_p4 = scmp.lt.s32.totalorder %s40_s26, %s40_s26 }
   0xb   :  { %p1382_p3 = scmp.ne.s32.totalorder %s40_s26, %s1381_s17  ;;  %p1387_p5 = scmp.lt.s32.totalorder %s1381_s17, %s1381_s17 }
   0xd   :  { %p1388_p6 = por %p1387_p5, %p1386_p4 }
   0xf   :  { %p1389_p7 = pnand %p1388_p6, %p1382_p3 }
  0x11   :  { %1392 = shalt.err (!%p1389_p7)
}
  0x12   :  { %s1512_s18 = smov 128   ;;  %s1513_s19 = smov 8  }
  0x13   :  { %45 = dma.hbm_to_vmem [thread:$0]  %s1725_s1, 2048, %s40_s26, [#allocation6], %s1512_s18, %s1512_s18, %s1513_s19  }
  0x14   :  { %s1514_s22 = smov [#allocation8]   ;;  %s1515_s24 = smov [#allocation2]  }
  0x15   :  { %s71_s23 = sshll.u32 %s1514_s22, 4  ;;  %s27_s25 = sshll.u32 %s1515_s24, 4  ;;  %s72_s23 = int_to_ptr.vmem [resolvable:$true] %s71_s23  ;;  %s28_s25 = int_to_ptr.vmem [resolvable:$true] %s27_s25 }
  0x16   :  { %s1393_s29 = scalar_lea.hbm %s1731_s7, 4096 }
  0x17   :  { %p1394_p8 = scmp.ne.s32.totalorder %s1731_s7, %s1393_s29  ;;  %p1397_p9 = scmp.lt.u32.totalorder %s1393_s29, %s1731_s7 }
  0x19   :  { %p1399_p10 = pnand %p1397_p9, %p1394_p8 }
  0x1b   :  { %1402 = shalt.err (!%p1399_p10)
}
  0x1c   :  { %s1403_s1 = scalar_lea.vmem %s72_s23, 4096  ;;  %p1408_p12 = scmp.lt.s32.totalorder %s72_s23, %s72_s23 }
  0x1d   :  { %p1404_p11 = scmp.ne.s32.totalorder %s72_s23, %s1403_s1  ;;  %p1409_p13 = scmp.lt.s32.totalorder %s1403_s1, %s1403_s1 }
  0x1f   :  { %p1410_p0 = por %p1409_p13, %p1408_p12 }
  0x21   :  { %p1411_p1 = pnand %p1410_p0, %p1404_p11 }
  0x23   :  { %1414 = shalt.err (!%p1411_p1)
}
  0x24   :  { %77 = dma.hbm_to_vmem [thread:$0]  %s1731_s7, 4096, %s72_s23, [#allocation9], %s1512_s18, %s1512_s18, %s1513_s19  }
  0x25   :  { %s1415_s22 = scalar_lea.hbm %s1724_s0, 128 }
  0x26   :  { %p1416_p2 = scmp.ne.s32.totalorder %s1724_s0, %s1415_s22  ;;  %p1419_p3 = scmp.lt.u32.totalorder %s1415_s22, %s1724_s0 }
  0x28   :  { %p1421_p4 = pnand %p1419_p3, %p1416_p2 }
  0x2a   :  { %1424 = shalt.err (!%p1421_p4)
}
  0x2b   :  { %s1425_s30 = scalar_lea.vmem %s28_s25, 128  ;;  %p1430_p6 = scmp.lt.s32.totalorder %s28_s25, %s28_s25 }
  0x2c   :  { %p1426_p5 = scmp.ne.s32.totalorder %s28_s25, %s1425_s30  ;;  %p1431_p7 = scmp.lt.s32.totalorder %s1425_s30, %s1425_s30 }
  0x2e   :  { %p1432_p8 = por %p1431_p7, %p1430_p6 }
  0x30   :  { %p1433_p9 = pnand %p1432_p8, %p1426_p5 }
  0x32   :  { %1436 = shalt.err (!%p1433_p9)
}
  0x33   :  { %s1516_s7 = smov 64   ;;  %s1517_s23 = smov 4  }
  0x34   :  { %33 = dma.hbm_to_vmem [thread:$0]  %s1724_s0, 128, %s28_s25, [#allocation3], %s1516_s7, %s1516_s7, %s1517_s23  }
  0x35   :  { %s1518_s16 = smov [#allocation7]   ;;  %s1519_s26 = smov [#allocation10]  }
  0x36   :  { %s55_s1 = sshll.u32 %s1518_s16, 4  ;;  %s87_s17 = sshll.u32 %s1519_s26, 4  ;;  %s56_s1 = int_to_ptr.vmem [resolvable:$true] %s55_s1  ;;  %s88_s17 = int_to_ptr.vmem [resolvable:$true] %s87_s17 }
  0x37   :  { %s1437_s22 = scalar_lea.hbm %s1728_s4, 4096 }
  0x38   :  { %p1438_p10 = scmp.ne.s32.totalorder %s1728_s4, %s1437_s22  ;;  %p1441_p11 = scmp.lt.u32.totalorder %s1437_s22, %s1728_s4 }
  0x3a   :  { %p1443_p12 = pnand %p1441_p11, %p1438_p10 }
  0x3c   :  { %1446 = shalt.err (!%p1443_p12)
}
  0x3d   :  { %s1447_s0 = scalar_lea.vmem %s56_s1, 4096  ;;  %p1452_p0 = scmp.lt.s32.totalorder %s56_s1, %s56_s1 }
  0x3e   :  { %p1448_p13 = scmp.ne.s32.totalorder %s56_s1, %s1447_s0  ;;  %p1453_p1 = scmp.lt.s32.totalorder %s1447_s0, %s1447_s0 }
  0x40   :  { %p1454_p2 = por %p1453_p1, %p1452_p0 }
  0x42   :  { %p1455_p3 = pnand %p1454_p2, %p1448_p13 }
  0x44   :  { %1458 = shalt.err (!%p1455_p3)
}
  0x45   :  { %61 = dma.hbm_to_vmem [thread:$0]  %s1728_s4, 4096, %s56_s1, [#allocation6], %s1512_s18, %s1512_s18, %s1513_s19  }
  0x46   :  { %s1459_s16 = scalar_lea.hbm %s1734_s10, 2048 }
  0x47   :  { %p1460_p4 = scmp.ne.s32.totalorder %s1734_s10, %s1459_s16  ;;  %p1463_p5 = scmp.lt.u32.totalorder %s1459_s16, %s1734_s10 }
  0x49   :  { %p1465_p6 = pnand %p1463_p5, %p1460_p4 }
  0x4b   :  { %1468 = shalt.err (!%p1465_p6)
}
  0x4c   :  { %s1469_s24 = scalar_lea.vmem %s88_s17, 2048  ;;  %p1474_p8 = scmp.lt.s32.totalorder %s88_s17, %s88_s17 }
  0x4d   :  { %p1470_p7 = scmp.ne.s32.totalorder %s88_s17, %s1469_s24  ;;  %p1475_p9 = scmp.lt.s32.totalorder %s1469_s24, %s1469_s24 }
  0x4f   :  { %p1476_p10 = por %p1475_p9, %p1474_p8 }
  0x51   :  { %p1477_p11 = pnand %p1476_p10, %p1470_p7 }
  0x53   :  { %1480 = shalt.err (!%p1477_p11)
}
  0x54   :  { %93 = dma.hbm_to_vmem [thread:$0]  %s1734_s10, 2048, %s88_s17, [#allocation9], %s1516_s7, %s1516_s7, %s1517_s23  }
  0x55   :  { %1503 = dma.done.wait [#allocation3], 128  }
  0x56   :  { %1504 = vsyncadd [#allocation3], 4294967168 }
  0x57   :  { %1505 = dma.done.wait [#allocation6], 6144  }
  0x58   :  { %1506 = vsyncadd [#allocation6], 4294961152 }
  0x59   :  { %1507 = dma.done.wait [#allocation9], 6144  }
  0x5a   :  { %1508 = vsyncadd [#allocation9], 4294961152  ;;  %v1520_v0 = vmov 0   ;;  %v1226_v1 = vld [vmem:[#allocation5 + $0x4] ss:$8 sps:$4 sm:$0xff]   ;;  %v1250_v27 = vld [vmem:[#allocation2] sm:$0xff]  }
  0x5b   :  { %250 = vmatprep.mubr.bf16.mxu0 %v1520_v0  ;;  %v1228_v2 = vld [vmem:[#allocation5] ss:$8 sps:$4 sm:$0xff]   ;;  %218 = vmatprep.subr.bf16.mxu0 %v1226_v1  ;;  %v1229_v3 = vld [vmem:[#allocation5 + $0x14] ss:$8 sps:$4 sm:$0xff]   ;;  %v1231_v4 = vld [vmem:[#allocation5 + $0x10] ss:$8 sps:$4 sm:$0xff]  }
  0x5c   :  { %219 = vmatpush1.bf16.msra.mxu0 %v1228_v2  ;;  %v1232_v5 = vld [vmem:[#allocation5 + $0x24] ss:$8 sps:$4 sm:$0xff]   ;;  %v1234_v6 = vld [vmem:[#allocation5 + $0x20] ss:$8 sps:$4 sm:$0xff]   ;;  %v1235_v7 = vld [vmem:[#allocation5 + $0x34] ss:$8 sps:$4 sm:$0xff]  }
  0x5d   :  { %220 = vmatprep.subr.bf16.mxu0 %v1229_v3  ;;  %v1237_v8 = vld [vmem:[#allocation5 + $0x30] ss:$8 sps:$4 sm:$0xff]   ;;  %v1238_v9 = vld [vmem:[#allocation5 + $0x44] ss:$8 sps:$4 sm:$0xff]   ;;  %v1253_v11 = vld [vmem:[#allocation7] ss:$8 sps:$4 sm:$0xff]  }
  0x5e   :  { %v1251_v10 = vld [vmem:[#allocation7 + $0x4] ss:$8 sps:$4 sm:$0xff]   ;;  %v1254_v12 = vld [vmem:[#allocation7 + $0x14] ss:$8 sps:$4 sm:$0xff]   ;;  %v1240_v13 = vld [vmem:[#allocation5 + $0x40] ss:$8 sps:$4 sm:$0xff]  }
  0x5f   :  { %495 = vmatprep.subr.bf16.mxu1 %v1251_v10  ;;  %v1256_v14 = vld [vmem:[#allocation7 + $0x10] ss:$8 sps:$4 sm:$0xff]   ;;  %v1241_v15 = vld [vmem:[#allocation5 + $0x54] ss:$8 sps:$4 sm:$0xff]   ;;  %v1257_v16 = vld [vmem:[#allocation7 + $0x24] ss:$8 sps:$4 sm:$0xff]  }
  0x60   :  { %221 = vmatpush1.bf16.msra.mxu0 %v1231_v4  ;;  %496 = vmatpush1.bf16.msra.mxu1 %v1253_v11  ;;  %v1243_v17 = vld [vmem:[#allocation5 + $0x50] ss:$8 sps:$4 sm:$0xff]   ;;  %v1259_v18 = vld [vmem:[#allocation7 + $0x20] ss:$8 sps:$4 sm:$0xff]   ;;  %v1244_v19 = vld [vmem:[#allocation5 + $0x64] ss:$8 sps:$4 sm:$0xff]  }
  0x61   :  { %222 = vmatprep.subr.bf16.mxu0 %v1232_v5  ;;  %497 = vmatprep.subr.bf16.mxu1 %v1254_v12  ;;  %v1260_v20 = vld [vmem:[#allocation7 + $0x34] ss:$8 sps:$4 sm:$0xff]   ;;  %v1246_v21 = vld [vmem:[#allocation5 + $0x60] ss:$8 sps:$4 sm:$0xff]   ;;  %v1262_v22 = vld [vmem:[#allocation7 + $0x30] ss:$8 sps:$4 sm:$0xff]   ;;  %v263_v12 = vlaneseq }
  0x62   :  { %v1247_v23 = vld [vmem:[#allocation5 + $0x74] ss:$8 sps:$4 sm:$0xff]   ;;  %v1263_v24 = vld [vmem:[#allocation7 + $0x44] ss:$8 sps:$4 sm:$0xff]   ;;  %v1249_v25 = vld [vmem:[#allocation5 + $0x70] ss:$8 sps:$4 sm:$0xff]  }
  0x63   :  { %v1265_v26 = vld [vmem:[#allocation7 + $0x40] ss:$8 sps:$4 sm:$0xff]   ;;  %v1266_v28 = vld [vmem:[#allocation7 + $0x54] ss:$8 sps:$4 sm:$0xff]   ;;  %v1268_v29 = vld [vmem:[#allocation7 + $0x50] ss:$8 sps:$4 sm:$0xff]  }
  0x64   :  { %223 = vmatpush1.bf16.msra.mxu0 %v1234_v6  ;;  %498 = vmatpush1.bf16.msra.mxu1 %v1256_v14  ;;  %v1269_v30 = vld [vmem:[#allocation7 + $0x64] ss:$8 sps:$4 sm:$0xff]   ;;  %v1271_v31 = vld [vmem:[#allocation7 + $0x60] ss:$8 sps:$4 sm:$0xff]   ;;  %v1272_v32 = vld [vmem:[#allocation7 + $0x74] ss:$8 sps:$4 sm:$0xff]  }
  0x65   :  { %224 = vmatprep.subr.bf16.mxu0 %v1235_v7  ;;  %499 = vmatprep.subr.bf16.mxu1 %v1257_v16  ;;  %v1274_v33 = vld [vmem:[#allocation7 + $0x70] ss:$8 sps:$4 sm:$0xff]   ;;  %v1275_v34 = vld [vmem:[#allocation7 + $0x84] ss:$8 sps:$4 sm:$0xff]   ;;  %v1277_v35 = vld [vmem:[#allocation7 + $0x80] ss:$8 sps:$4 sm:$0xff]  }
  0x66   :  { %v1278_v36 = vld [vmem:[#allocation7 + $0x94] ss:$8 sps:$4 sm:$0xff]   ;;  %v1280_v37 = vld [vmem:[#allocation7 + $0x90] ss:$8 sps:$4 sm:$0xff]   ;;  %v1281_v38 = vld [vmem:[#allocation7 + $0xa4] ss:$8 sps:$4 sm:$0xff]  }
  0x67   :  { %v1283_v39 = vld [vmem:[#allocation7 + $0xa0] ss:$8 sps:$4 sm:$0xff]   ;;  %v1284_v40 = vld [vmem:[#allocation7 + $0xb4] ss:$8 sps:$4 sm:$0xff]   ;;  %v1286_v41 = vld [vmem:[#allocation7 + $0xb0] ss:$8 sps:$4 sm:$0xff]  }
  0x68   :  { %225 = vmatpush1.bf16.msra.mxu0 %v1237_v8  ;;  %500 = vmatpush1.bf16.msra.mxu1 %v1259_v18  ;;  %v1287_v42 = vld [vmem:[#allocation7 + $0xc4] ss:$8 sps:$4 sm:$0xff]   ;;  %v1289_v43 = vld [vmem:[#allocation7 + $0xc0] ss:$8 sps:$4 sm:$0xff]   ;;  %v1290_v44 = vld [vmem:[#allocation7 + $0xd4] ss:$8 sps:$4 sm:$0xff]  }
  0x69   :  { %226 = vmatprep.subr.bf16.mxu0 %v1238_v9  ;;  %501 = vmatprep.subr.bf16.mxu1 %v1260_v20  ;;  %v1292_v45 = vld [vmem:[#allocation7 + $0xd0] ss:$8 sps:$4 sm:$0xff]   ;;  %v1293_v46 = vld [vmem:[#allocation7 + $0xe4] ss:$8 sps:$4 sm:$0xff]   ;;  %v1295_v47 = vld [vmem:[#allocation7 + $0xe0] ss:$8 sps:$4 sm:$0xff]  }
  0x6a   :  { %v1296_v48 = vld [vmem:[#allocation7 + $0xf4] ss:$8 sps:$4 sm:$0xff]   ;;  %v1298_v49 = vld [vmem:[#allocation7 + $0xf0] ss:$8 sps:$4 sm:$0xff]   ;;  %v1299_v50 = vld [vmem:[#allocation8] ss:$8 sps:$4 sm:$0xff]  }
  0x6b   :  { %v1301_v51 = vld [vmem:[#allocation8 + $0x4] ss:$8 sps:$4 sm:$0xff]   ;;  %v1304_v52 = vld [vmem:[#allocation8 + $0x14] ss:$8 sps:$4 sm:$0xff]   ;;  %v1302_v53 = vld [vmem:[#allocation8 + $0x10] ss:$8 sps:$4 sm:$0xff]  }
  0x6c   :  { %227 = vmatpush1.bf16.msra.mxu0 %v1240_v13  ;;  %502 = vmatpush1.bf16.msra.mxu1 %v1262_v22  ;;  %v1307_v54 = vld [vmem:[#allocation8 + $0x24] ss:$8 sps:$4 sm:$0xff]   ;;  %v1305_v55 = vld [vmem:[#allocation8 + $0x20] ss:$8 sps:$4 sm:$0xff]   ;;  %v1310_v56 = vld [vmem:[#allocation8 + $0x34] ss:$8 sps:$4 sm:$0xff]  }
  0x6d   :  { %228 = vmatprep.subr.bf16.mxu0 %v1241_v15  ;;  %503 = vmatprep.subr.bf16.mxu1 %v1263_v24  ;;  %v1308_v57 = vld [vmem:[#allocation8 + $0x30] ss:$8 sps:$4 sm:$0xff]   ;;  %v1313_v58 = vld [vmem:[#allocation8 + $0x44] ss:$8 sps:$4 sm:$0xff]   ;;  %v1311_v59 = vld [vmem:[#allocation8 + $0x40] ss:$8 sps:$4 sm:$0xff]  }
  0x6e   :  { %v1316_v60 = vld [vmem:[#allocation8 + $0x54] ss:$8 sps:$4 sm:$0xff]   ;;  %v1314_v61 = vld [vmem:[#allocation8 + $0x50] ss:$8 sps:$4 sm:$0xff]   ;;  %v1319_v62 = vld [vmem:[#allocation8 + $0x64] ss:$8 sps:$4 sm:$0xff]  }
  0x6f   :  { %v1317_v63 = vld [vmem:[#allocation8 + $0x60] ss:$8 sps:$4 sm:$0xff]   ;;  %v1322_v0 = vld [vmem:[#allocation8 + $0x74] ss:$8 sps:$4 sm:$0xff]   ;;  %v1320_v1 = vld [vmem:[#allocation8 + $0x70] ss:$8 sps:$4 sm:$0xff]  }
  0x70   :  { %229 = vmatpush1.bf16.msra.mxu0 %v1243_v17  ;;  %504 = vmatpush1.bf16.msra.mxu1 %v1265_v26  ;;  %v1325_v2 = vld [vmem:[#allocation8 + $0x84] ss:$8 sps:$4 sm:$0xff]   ;;  %v1323_v3 = vld [vmem:[#allocation8 + $0x80] ss:$8 sps:$4 sm:$0xff]   ;;  %v1328_v4 = vld [vmem:[#allocation8 + $0x94] ss:$8 sps:$4 sm:$0xff]  }
  0x71   :  { %230 = vmatprep.subr.bf16.mxu0 %v1244_v19  ;;  %505 = vmatprep.subr.bf16.mxu1 %v1266_v28  ;;  %v1326_v5 = vld [vmem:[#allocation8 + $0x90] ss:$8 sps:$4 sm:$0xff]   ;;  %v1331_v6 = vld [vmem:[#allocation8 + $0xa4] ss:$8 sps:$4 sm:$0xff]   ;;  %v1329_v7 = vld [vmem:[#allocation8 + $0xa0] ss:$8 sps:$4 sm:$0xff]  }
  0x72   :  { %v1334_v8 = vld [vmem:[#allocation8 + $0xb4] ss:$8 sps:$4 sm:$0xff]   ;;  %v1332_v9 = vld [vmem:[#allocation8 + $0xb0] ss:$8 sps:$4 sm:$0xff]   ;;  %v1337_v10 = vld [vmem:[#allocation8 + $0xc4] ss:$8 sps:$4 sm:$0xff]  }
  0x73   :  { %v1335_v11 = vld [vmem:[#allocation8 + $0xc0] ss:$8 sps:$4 sm:$0xff]   ;;  %v264_v13 = vshrl.u32 %v263_v12, 7  ;;  %v261_v15 = vld [vmem:[%s1726_s2] sm:$0x3] }
  0x74   :  { %231 = vmatpush1.bf16.msra.mxu0 %v1246_v21  ;;  %506 = vmatpush1.bf16.msra.mxu1 %v1268_v29  ;;  %v277_v17 = vld [vmem:[%s1727_s3] sm:$0x3] }
  0x75   :  { %232 = vmatprep.subr.bf16.mxu0 %v1247_v23  ;;  %507 = vmatprep.subr.bf16.mxu1 %v1269_v30  ;;  %v1668_v14 = vsub.s32 0, %v264_v13  ;;  %v1673_v16 = vsub.s32 1, %v264_v13 }
  0x77   :  { %v266_v18 = vrot.slane %v261_v15, %v1668_v14  ;;  %v270_v19 = vrot.slane %v261_v15, %v1673_v16  ;;  %v282_v20 = vrot.slane %v277_v17, %v1668_v14  ;;  %v286_v22 = vrot.slane %v277_v17, %v1673_v16 }
  0x78   :  { %233 = vmatpush1.bf16.msra.mxu0 %v1249_v25  ;;  %508 = vmatpush1.bf16.msra.mxu1 %v1271_v31 }
  0x79   :  { %509 = vmatprep.subr.bf16.mxu1 %v1272_v32  ;;  %772 = vmatprep.subr.bf16.mxu0 %v1301_v51  ;;  %v1348_v51 = vld [vmem:[#allocation10] sm:$0xff]  }
  0x7b   :  { %251 = vmatmul.mubr.bf16.vlgmr.msra.gmra.mrb[0].mxu0 %v1250_v27 }
  0x7c   :  { %510 = vmatpush1.bf16.msra.mxu1 %v1274_v33  ;;  %773 = vmatpush1.bf16.msra.mxu0 %v1299_v50  ;;  %v1347_v50 = vld [vmem:[#allocation10 + $0x40] sm:$0xff]  }
  0x7d   :  { %511 = vmatprep.subr.bf16.mxu1 %v1275_v34  ;;  %774 = vmatprep.subr.bf16.mxu0 %v1304_v52  ;;  %v1349_v52 = vld [vmem:[#allocation10 + $0x48] sm:$0xff]  }
  0x80   :  { %512 = vmatpush1.bf16.msra.mxu1 %v1277_v35  ;;  %775 = vmatpush1.bf16.msra.mxu0 %v1302_v53  ;;  %v1350_v53 = vld [vmem:[#allocation10 + $0x8] sm:$0xff]  }
  0x81   :  { %513 = vmatprep.subr.bf16.mxu1 %v1278_v36  ;;  %776 = vmatprep.subr.bf16.mxu0 %v1307_v54  ;;  %v1351_v54 = vld [vmem:[#allocation10 + $0x50] sm:$0xff]  }
  0x84   :  { %514 = vmatpush1.bf16.msra.mxu1 %v1280_v37  ;;  %777 = vmatpush1.bf16.msra.mxu0 %v1305_v55  ;;  %v1352_v55 = vld [vmem:[#allocation10 + $0x10] sm:$0xff]  }
  0x85   :  { %515 = vmatprep.subr.bf16.mxu1 %v1281_v38  ;;  %778 = vmatprep.subr.bf16.mxu0 %v1310_v56  ;;  %v1353_v56 = vld [vmem:[#allocation10 + $0x58] sm:$0xff]  }
  0x88   :  { %516 = vmatpush1.bf16.msra.mxu1 %v1283_v39  ;;  %779 = vmatpush1.bf16.msra.mxu0 %v1308_v57  ;;  %v1354_v57 = vld [vmem:[#allocation10 + $0x18] sm:$0xff]  }
  0x89   :  { %517 = vmatprep.subr.bf16.mxu1 %v1284_v40  ;;  %780 = vmatprep.subr.bf16.mxu0 %v1313_v58  ;;  %v1355_v58 = vld [vmem:[#allocation10 + $0x60] sm:$0xff]  }
  0x8c   :  { %518 = vmatpush1.bf16.msra.mxu1 %v1286_v41  ;;  %781 = vmatpush1.bf16.msra.mxu0 %v1311_v59  ;;  %v538_v59 = vld [vmem:[%s1729_s5] sm:$0x3] }
  0x8d   :  { %519 = vmatprep.subr.bf16.mxu1 %v1287_v42  ;;  %782 = vmatprep.subr.bf16.mxu0 %v1316_v60  ;;  %v554_v60 = vld [vmem:[%s1730_s6] sm:$0x3] }
  0x90   :  { %520 = vmatpush1.bf16.msra.mxu1 %v1289_v43  ;;  %783 = vmatpush1.bf16.msra.mxu0 %v1314_v61  ;;  %v543_v61 = vrot.slane %v538_v59, %v1668_v14 }
  0x91   :  { %521 = vmatprep.subr.bf16.mxu1 %v1290_v44  ;;  %784 = vmatprep.subr.bf16.mxu0 %v1319_v62  ;;  %v1340_v44 = vld [vmem:[#allocation8 + $0xd4] ss:$8 sps:$4 sm:$0xff]   ;;  %v547_v62 = vrot.slane %v538_v59, %v1673_v16 }
  0x94   :  { %522 = vmatpush1.bf16.msra.mxu1 %v1292_v45  ;;  %785 = vmatpush1.bf16.msra.mxu0 %v1317_v63  ;;  %v1338_v45 = vld [vmem:[#allocation8 + $0xd0] ss:$8 sps:$4 sm:$0xff]   ;;  %v559_v63 = vrot.slane %v554_v60, %v1668_v14 }
  0x95   :  { %523 = vmatprep.subr.bf16.mxu1 %v1293_v46  ;;  %786 = vmatprep.subr.bf16.mxu0 %v1322_v0  ;;  %v1343_v46 = vld [vmem:[#allocation8 + $0xe4] ss:$8 sps:$4 sm:$0xff]  }
  0x98   :  { %524 = vmatpush1.bf16.msra.mxu1 %v1295_v47  ;;  %787 = vmatpush1.bf16.msra.mxu0 %v1320_v1  ;;  %v1341_v47 = vld [vmem:[#allocation8 + $0xe0] ss:$8 sps:$4 sm:$0xff]   ;;  %v563_v1 = vrot.slane %v554_v60, %v1673_v16 }
  0x99   :  { %525 = vmatprep.subr.bf16.mxu1 %v1296_v48  ;;  %788 = vmatprep.subr.bf16.mxu0 %v1325_v2  ;;  %v1346_v48 = vld [vmem:[#allocation8 + $0xf4] ss:$8 sps:$4 sm:$0xff]  }
  0x9c   :  { %526 = vmatpush1.bf16.msra.mxu1 %v1298_v49  ;;  %789 = vmatpush1.bf16.msra.mxu0 %v1323_v3  ;;  %v1344_v49 = vld [vmem:[#allocation8 + $0xf0] ss:$8 sps:$4 sm:$0xff]  }
  0x9d   :  { %790 = vmatprep.subr.bf16.mxu0 %v1328_v4  ;;  %1193 = vmatprep.subr.bf16.mxu1 %v1347_v50 }
  0xa0   :  { %791 = vmatpush1.bf16.msra.mxu0 %v1326_v5 }
  0xa1   :  { %792 = vmatprep.subr.bf16.mxu0 %v1331_v6 }
  0xa4   :  { %793 = vmatpush1.bf16.msra.mxu0 %v1329_v7 }
  0xa5   :  { %794 = vmatprep.subr.bf16.mxu0 %v1334_v8 }
  0xa8   :  { %795 = vmatpush1.bf16.msra.mxu0 %v1332_v9 }
  0xa9   :  { %796 = vmatprep.subr.bf16.mxu0 %v1337_v10 }
  0xac   :  { %797 = vmatpush1.bf16.msra.mxu0 %v1335_v11 }
  0xad   :  { %798 = vmatprep.subr.bf16.mxu0 %v1340_v44 }
  0xb0   :  { %799 = vmatpush1.bf16.msra.mxu0 %v1338_v45 }
  0xb1   :  { %800 = vmatprep.subr.bf16.mxu0 %v1343_v46 }
  0xb4   :  { %801 = vmatpush1.bf16.msra.mxu0 %v1341_v47 }
  0xb5   :  { %802 = vmatprep.subr.bf16.mxu0 %v1346_v48 }
  0xb8   :  { %803 = vmatpush1.bf16.msra.mxu0 %v1344_v49 }
 0x14e   :  { %v252_v21 = vpop.f32.mrb[0].mxu0 }
 0x14f   :  { %v273_v23 = vmul.f32 %v266_v18, %v252_v21  ;;  %v254_v24 = vpop.f32.mrb[1].mxu0 }
 0x150   :  { %v274_v25 = vmul.f32 %v270_v19, %v254_v24  ;;  %v256_v26 = vpop.f32.mrb[2].mxu0 }
 0x151   :  { %v289_v27 = vadd.f32 %v282_v20, %v273_v23  ;;  %v275_v28 = vmul.f32 %v266_v18, %v256_v26  ;;  %v258_v29 = vpop.f32.mrb[3].mxu0  ;;  %v1356_v26 = vld [vmem:[#allocation10 + $0x20] sm:$0xff]  }
 0x152   :  { %v290_v30 = vadd.f32 %v286_v22, %v274_v25  ;;  %v276_v31 = vmul.f32 %v270_v19, %v258_v29  ;;  %v1359_v29 = vld [vmem:[#allocation10 + $0x70] sm:$0xff]  }
 0x153   :  { %v293_v32 = vmul.f32 0.01, %v289_v27  ;;  %v291_v33 = vadd.f32 %v282_v20, %v275_v28  ;;  %v1358_v28 = vld [vmem:[#allocation10 + $0x28] sm:$0xff]  }
 0x154   :  { %v292_v34 = vadd.f32 %v286_v22, %v276_v31  ;;  %v294_v35 = vmul.f32 0.01, %v290_v30  ;;  %v1361_v31 = vld [vmem:[#allocation10 + $0x78] sm:$0xff]  }
 0x155   :  { %v295_v36 = vmul.f32 0.01, %v291_v33  ;;  %v297_v38 = vmax.f32 %v289_v27, %v293_v32  ;;  %v1357_v27 = vld [vmem:[#allocation10 + $0x68] sm:$0xff]   ;;  %v1362_v32 = vld [vmem:[#allocation10 + $0x38] sm:$0xff]  }
 0x156   :  { %v296_v37 = vmul.f32 0.01, %v292_v34  ;;  %v298_v40 = vmax.f32 %v290_v30, %v294_v35  ;;  %v1360_v30 = vld [vmem:[#allocation10 + $0x30] sm:$0xff]  }
 0x157   :  { %v299_v39 = vmax.f32 %v291_v33, %v295_v36  ;;  %v815_v33 = vld [vmem:[%s1732_s8] sm:$0x3] }
 0x158   :  { %v300_v41 = vmax.f32 %v292_v34, %v296_v37  ;;  %v831_v34 = vld [vmem:[%s1733_s9] sm:$0x3]  ;;  %v820_v35 = vrot.slane %v815_v33, %v1668_v14  ;;  %v824_v36 = vrot.slane %v815_v33, %v1673_v16 }
 0x159   :  { %v301_v42 = vpack.c.bf16 %v299_v39, %v297_v38  ;;  %v836_v37 = vrot.slane %v831_v34, %v1668_v14  ;;  %v840_v39 = vrot.slane %v831_v34, %v1673_v16 }
 0x15a   :  { %v302_v43 = vpack.c.bf16 %v300_v41, %v298_v40 }
 0x15c   :  { %527 = vmatprep.mubr.bf16.mxu1 %v302_v43 }
 0x15d   :  { %528 = vmatmul.mubr.bf16.vlgmr.msra.gmra.mrb[0].mxu1 %v301_v42 }
 0x15e   :  { %1194 = vmatpush3.bf16.msra.mxu1 %v1348_v51 }
 0x15f   :  { %1195 = vmatprep.subr.bf16.mxu1 %v1349_v52 }
 0x162   :  { %1196 = vmatpush3.bf16.msra.mxu1 %v1350_v53 }
 0x163   :  { %1197 = vmatprep.subr.bf16.mxu1 %v1351_v54 }
 0x166   :  { %1198 = vmatpush3.bf16.msra.mxu1 %v1352_v55 }
 0x167   :  { %1199 = vmatprep.subr.bf16.mxu1 %v1353_v56 }
 0x16a   :  { %1200 = vmatpush3.bf16.msra.mxu1 %v1354_v57 }
 0x16b   :  { %1201 = vmatprep.subr.bf16.mxu1 %v1355_v58 }
 0x16e   :  { %1202 = vmatpush3.bf16.msra.mxu1 %v1356_v26 }
 0x16f   :  { %1203 = vmatprep.subr.bf16.mxu1 %v1357_v27 }
 0x172   :  { %1204 = vmatpush3.bf16.msra.mxu1 %v1358_v28 }
 0x173   :  { %1205 = vmatprep.subr.bf16.mxu1 %v1359_v29 }
 0x176   :  { %1206 = vmatpush3.bf16.msra.mxu1 %v1360_v30 }
 0x177   :  { %1207 = vmatprep.subr.bf16.mxu1 %v1361_v31 }
 0x17a   :  { %1208 = vmatpush3.bf16.msra.mxu1 %v1362_v32 }
 0x230   :  { %v529_v0 = vpop.f32.mrb[0].mxu1 }
 0x231   :  { %v550_v2 = vmul.f32 %v543_v61, %v529_v0  ;;  %v531_v3 = vpop.f32.mrb[1].mxu1 }
 0x232   :  { %v551_v4 = vmul.f32 %v547_v62, %v531_v3  ;;  %v533_v5 = vpop.f32.mrb[2].mxu1 }
 0x233   :  { %v566_v6 = vadd.f32 %v559_v63, %v550_v2  ;;  %v552_v7 = vmul.f32 %v543_v61, %v533_v5  ;;  %v535_v8 = vpop.f32.mrb[3].mxu1  ;;  %v1191_v61 = vld [vmem:[%s1735_s11] ss:$0 sm:$0xff]  ;;  %s1521_s11 = smov [#allocation11]  }
 0x234   :  { %v567_v9 = vadd.f32 %v563_v1, %v551_v4  ;;  %v553_v10 = vmul.f32 %v547_v62, %v535_v8  ;;  %v1045_v62 = vand.u32 127, %v263_v12  ;;  %v1192_v2 = vld [vmem:[%s1736_s12] ss:$0 sm:$0xff]  ;;  %s1080_s12 = sshll.u32 %s1521_s11, 4  ;;  %s1081_s12 = int_to_ptr.vmem [resolvable:$true] %s1080_s12 }
 0x235   :  { %v570_v11 = vmul.f32 0.01, %v566_v6  ;;  %v568_v13 = vadd.f32 %v559_v63, %v552_v7  ;;  %s1481_s14 = scalar_lea.vmem %s1081_s12, 256  ;;  %p1486_p13 = scmp.lt.s32.totalorder %s1081_s12, %s1081_s12 }
 0x236   :  { %v571_v15 = vmul.f32 0.01, %v567_v9  ;;  %v569_v17 = vadd.f32 %v563_v1, %v553_v10  ;;  %vm1046_vm0 = vcmp.lt.s32.totalorder %v1045_v62, 100  ;;  %p1482_p12 = scmp.ne.s32.totalorder %s1081_s12, %s1481_s14  ;;  %p1487_p0 = scmp.lt.s32.totalorder %s1481_s14, %s1481_s14 }
 0x237   :  { %v572_v18 = vmul.f32 0.01, %v568_v13  ;;  %v574_v20 = vmax.f32 %v566_v6, %v570_v11 }
 0x238   :  { %v573_v19 = vmul.f32 0.01, %v569_v17  ;;  %v575_v22 = vmax.f32 %v567_v9, %v571_v15  ;;  %p1488_p1 = por %p1487_p0, %p1486_p13 }
 0x239   :  { %v576_v21 = vmax.f32 %v568_v13, %v572_v18 }
 0x23a   :  { %v577_v23 = vmax.f32 %v569_v17, %v573_v19  ;;  %p1489_p2 = pnand %p1488_p1, %p1482_p12 }
 0x23b   :  { %v578_v24 = vpack.c.bf16 %v576_v21, %v574_v20 }
 0x23c   :  { %v579_v25 = vpack.c.bf16 %v577_v23, %v575_v22 }
 0x23e   :  { %804 = vmatprep.mubr.bf16.mxu0 %v579_v25 }
 0x23f   :  { %805 = vmatmul.mubr.bf16.vlgmr.msra.gmra.mrb[4].mxu0 %v578_v24 }
 0x312   :  { %v806_v38 = vpop.f32.mrb[4].mxu0 }
 0x313   :  { %v827_v40 = vmul.f32 %v820_v35, %v806_v38  ;;  %v808_v41 = vpop.f32.mrb[5].mxu0 }
 0x314   :  { %v828_v42 = vmul.f32 %v824_v36, %v808_v41  ;;  %v810_v43 = vpop.f32.mrb[6].mxu0 }
 0x315   :  { %v843_v44 = vadd.f32 %v836_v37, %v827_v40  ;;  %v829_v45 = vmul.f32 %v820_v35, %v810_v43  ;;  %v812_v46 = vpop.f32.mrb[7].mxu0 }
 0x316   :  { %v844_v47 = vadd.f32 %v840_v39, %v828_v42  ;;  %v830_v48 = vmul.f32 %v824_v36, %v812_v46 }
 0x317   :  { %v847_v49 = vmul.f32 0.01, %v843_v44  ;;  %v845_v50 = vadd.f32 %v836_v37, %v829_v45 }
 0x318   :  { %v848_v51 = vmul.f32 0.01, %v844_v47  ;;  %v846_v52 = vadd.f32 %v840_v39, %v830_v48 }
 0x319   :  { %v849_v53 = vmul.f32 0.01, %v845_v50  ;;  %v851_v55 = vmax.f32 %v843_v44, %v847_v49 }
 0x31a   :  { %v850_v54 = vmul.f32 0.01, %v846_v52  ;;  %v852_v56 = vmax.f32 %v844_v47, %v848_v51 }
 0x31b   :  { %v853_v14 = vmax.f32 %v845_v50, %v849_v53 }
 0x31c   :  { %v854_v57 = vmax.f32 %v846_v52, %v850_v54 }
 0x31d   :  { %v855_v16 = vpack.c.bf16 %v853_v14, %v851_v55 }
 0x31e   :  { %v856_v58 = vpack.c.bf16 %v854_v57, %v852_v56 }
 0x320   :  { %1017 = vmatprep.mubr.bf16.mxu1 %v856_v58 }
 0x321   :  { %1018 = vmatmul.mubr.bf16.vlgmr.msra.gmra.mrb[4].mxu1 %v855_v16 }
 0x3f4   :  { %v1209_v59 = vpop.f32.mrb[4].mxu1 }
 0x3f5   :  { %v1210_v60 = vpop.f32.mrb[5].mxu1 }
 0x3f6   :  { %v1211_v63 = vadd.f32 %v1210_v60, %v1209_v59  ;;  %v1212_v0 = vpop.f32.mrb[6].mxu1 }
 0x3f7   :  { %v1213_v1 = vpop.f32.mrb[7].mxu1 }
 0x3f8   :  { %v1033_v3 = vmul.f32 %v1211_v63, %v1191_v61  ;;  %v1214_v4 = vadd.f32 %v1213_v1, %v1212_v0 }
 0x3fa   :  { %v1034_v5 = vmul.f32 %v1214_v4, %v1191_v61  ;;  %v1042_v6 = vadd.f32 %v1192_v2, %v1033_v3 }
 0x3fc   :  { %v1047_v7 = vsel %vm1046_vm0, %v1042_v6, -inf  ;;  %v1043_v8 = vadd.f32 %v1192_v2, %v1034_v5 }
 0x3fd   :  { %1049 = vmax.xlane.f32.xlu0 %v1047_v7 }
 0x3fe   :  { %v1048_v9 = vsel %vm1046_vm0, %v1043_v8, -inf }
 0x401   :  { %1051 = vmax.xlane.f32.xlu0 %v1048_v9 }
 0x48a   :  { %v1050_v10 = vpop.xlane.xlu0 %1049 }
 0x48b   :  { %v1053_v11 = vsub.f32 %v1047_v7, %v1050_v10 }
 0x48d   :  { %v1055_v12 = vmul.f32 1.442695, %v1053_v11 }
 0x48e   :  { %v1052_v13 = vpop.xlane.xlu0 %1051 }
 0x48f   :  { %1363 = vpow2.f32 %v1055_v12  ;;  %v1054_v15 = vsub.f32 %v1048_v9, %v1052_v13 }
 0x491   :  { %v1057_v17 = vmul.f32 1.442695, %v1054_v15 }
 0x493   :  { %1365 = vpow2.f32 %v1057_v17 }
 0x499   :  { %v1364_v18 = vpop.eup %1363 }
 0x49a   :  { %1059 = vadd.xlane.f32.xlu1 %v1364_v18 }
 0x49d   :  { %v1366_v19 = vpop.eup %1365 }
 0x49e   :  { %1061 = vadd.xlane.f32.xlu1 %v1366_v19 }
 0x527   :  { %v1060_v20 = vpop.xlane.xlu1 %1059 }
 0x528   :  { %1367 = vrcp.f32 %v1060_v20 }
 0x52b   :  { %v1062_v21 = vpop.xlane.xlu1 %1061 }
 0x52c   :  { %1369 = vrcp.f32 %v1062_v21 }
 0x532   :  { %v1368_v22 = vpop.eup %1367 }
 0x533   :  { %v1065_v23 = vmul.f32 %v1368_v22, %v1060_v20 }
 0x535   :  { %v1067_v24 = vsub.f32 2.0, %v1065_v23 }
 0x536   :  { %v1370_v25 = vpop.eup %1369 }
 0x537   :  { %v1069_v26 = vmul.f32 %v1368_v22, %v1067_v24  ;;  %v1066_v27 = vmul.f32 %v1370_v25, %v1062_v21 }
 0x539   :  { %v1068_v28 = vsub.f32 2.0, %v1066_v27  ;;  %v1071_v29 = vmul.f32 %v1364_v18, %v1069_v26 }
 0x53b   :  { %v1070_v30 = vmul.f32 %v1370_v25, %v1068_v28  ;;  %1073 = vst [vmem:[#allocation11] sm:$0xff] %v1071_v29 }
 0x53d   :  { %v1072_v31 = vmul.f32 %v1366_v19, %v1070_v30 }
 0x53f   :  { %1074 = vst [vmem:[#allocation11 + $0x8] sm:$0xff] %v1072_v31 }
 0x540   :  { %1492 = shalt.err (!%p1489_p2)
}
 0x541   :  { %s1493_s26 = scalar_lea.hbm %s1737_s13, 256 }
 0x542   :  { %p1494_p3 = scmp.ne.s32.totalorder %s1737_s13, %s1493_s26  ;;  %p1497_p4 = scmp.lt.u32.totalorder %s1493_s26, %s1737_s13 }
 0x544   :  { %p1499_p5 = pnand %p1497_p4, %p1494_p3 }
 0x546   :  { %1502 = shalt.err (!%p1499_p5)
}
 0x547   :  { %1086 = dma.vmem_to_hbm [thread:$0]  %s1081_s12, 256, %s1737_s13, [#allocation4], %s1512_s18, %s1512_s18, %s1513_s19  }
 0x548   :  { %1509 = dma.done.wait [#allocation4], 256  }
 0x549   :  { %1510 = vsyncadd [#allocation4], 4294967040 }
 0x54a   :  { %1090 = vsyncpa [#allocation3], 1 }
 0x54b   :  { %1091 = vsyncpa [#allocation6], 1 }
 0x54c   :  { %1092 = vsyncpa [#allocation9], 1 }
 0x54d   :  { %1093 = vsyncpa [#allocation4], 1 }

</bundles_post_ra>
